<compile_context>
chip_gen: v7x
topology: tpu7x:2x2x1
jax: 0.10.0
libtpu: 0.0.40
codegen_flags: <defaults>
</compile_context>

<pallas_src>
import jax
import jax.numpy as jnp
from jax import lax
from jax.experimental import pallas as pl
from jax.experimental.pallas import tpu as pltpu


def _predictor_kernel(xi_ref, xj_ref, wd_ref, wdist_ref,
                      norms_ref, dist_ref, diff_ref):
    # xi_ref: (1, TI, E)   row tile of the sentence embeddings
    # xj_ref: (1, TJ, E)   column tile of the sentence embeddings
    # wd_ref, wdist_ref: (E, O) transposed Linear weights
    # norms_ref: (1, 1, TI)        lane-dense depth norms (revisited across j)
    # dist_ref : (1, TI, TJ)       squared pairwise distances
    # diff_ref : (1, TI, TJ * O)   lane-dense flat differences tile
    x_i = xi_ref[0]                      # (TI, E)
    x_j = xj_ref[0]                      # (TJ, E)
    TI = x_i.shape[0]
    TJ = x_j.shape[0]
    O = wd_ref.shape[1]

    w_dist = wdist_ref[...]
    # Distance transform for both row and column tiles (tiny MXU matmuls).
    dists_i = jnp.dot(x_i, w_dist, preferred_element_type=jnp.float32)   # (TI, O)
    dists_j = jnp.dot(x_j, w_dist, preferred_element_type=jnp.float32)   # (TJ, O)

    ones_row = jnp.ones((1, O), dtype=jnp.float32)

    # --- norms (depth path): compute once per (b, i) tile; the norms output
    # block is mapped identically for every j, so it stays resident in VMEM and
    # is written back once after the last j step (hence j is "arbitrary").
    @pl.when(pl.program_id(2) == 0)
    def _():
        depths = jnp.dot(x_i, wd_ref[...], preferred_element_type=jnp.float32)  # (TI, O)
        # Row-oriented (lane-dense) squared norms via a tiny MXU contraction:
        # (1, O) . (TI, O)^T  -> (1, TI).  Avoids any sublane->lane relayout.
        norms_ref[0] = lax.dot_general(
            ones_row, depths * depths,
            dimension_numbers=(((1,), (1,)), ((), ())),
            preferred_element_type=jnp.float32)                                  # (1, TI)

    # --- distances via the Gram-matrix identity (MXU instead of L^2 XLU reduces):
    #   dist[i, j] = ||d_i||^2 + ||d_j||^2 - 2 * <d_i, d_j>
    g = lax.dot_general(dists_i, dists_j,
                        dimension_numbers=(((1,), (1,)), ((), ())),
                        preferred_element_type=jnp.float32)                       # (TI, TJ)
    ni = jnp.sum(dists_i * dists_i, axis=-1, keepdims=True)                       # (TI, 1) column
    nj = lax.dot_general(ones_row, dists_j * dists_j,
                         dimension_numbers=(((1,), (1,)), ((), ())),
                         preferred_element_type=jnp.float32)                      # (1, TJ) row
    # Clamp at 0: cancellation can produce tiny negatives for near-identical rows.
    dist_ref[0] = jnp.maximum(ni + nj - 2.0 * g, 0.0)

    # --- differences, stored lane-dense as (TI, TJ*O).
    # Assemble the flat tile with static minor-axis concatenates of (TI, O)
    # pieces (well-supported lowering); each stored chunk is a full-width,
    # lane-aligned slab of tjc*O >= 128 lanes when O*8 >= 128.
    if TJ % 8 == 0 and TJ > 8:
        tjc = 8
    else:
        tjc = TJ
    for jc in range(0, TJ, tjc):
        pieces = [dists_i - dists_j[jj:jj + 1, :] for jj in range(jc, jc + tjc)]
        diff_ref[0, :, jc * O:(jc + tjc) * O] = jnp.concatenate(pieces, axis=-1)


def _pick_tile(n, max_tile):
    """Largest divisor of n that is <= max_tile and a multiple of 8 (else n)."""
    if n <= max_tile:
        return n
    for t in range(max_tile, 0, -1):
        if n % t == 0 and t % 8 == 0:
            return t
    return n


def directed_graph_predictor_forward(emb_sentences, w_depth, w_distance,
                                     *, ti_max=128, tj_max=128):
    """emb_sentences: (B, L, E); w_depth/w_distance: (O, E) torch-Linear layout.

    Tile caps (128) are sized so that the double-buffered lane-dense diff block
    plus intermediates stay well inside v7x's 64 MiB VMEM; on v5e/v6e the same
    config is also comfortable (raise ti_max/tj_max there to amortize per-step
    overhead if desired).
    """
    B, L, E = emb_sentences.shape
    O = w_depth.shape[0]
    TI = _pick_tile(L, ti_max)
    TJ = _pick_tile(L, tj_max)

    # Transpose weights so the kernel computes x @ W  (== torch Linear x @ W.T).
    wd_t = jnp.asarray(w_depth, jnp.float32).T        # (E, O)
    wdist_t = jnp.asarray(w_distance, jnp.float32).T  # (E, O)
    x = jnp.asarray(emb_sentences, jnp.float32)

    norms3, distances, diff_flat = pl.pallas_call(
        _predictor_kernel,
        out_shape=(
            jax.ShapeDtypeStruct((B, 1, L), jnp.float32),       # lane-dense norms
            jax.ShapeDtypeStruct((B, L, L), jnp.float32),       # distances
            jax.ShapeDtypeStruct((B, L, L * O), jnp.float32),   # lane-dense flat diffs
        ),
        grid=(B, L // TI, L // TJ),
        in_specs=[
            pl.BlockSpec((1, TI, E), lambda b, i, j: (b, i, 0)),   # row tile
            pl.BlockSpec((1, TJ, E), lambda b, i, j: (b, j, 0)),   # column tile
            pl.BlockSpec((E, O), lambda b, i, j: (0, 0)),          # depth weight
            pl.BlockSpec((E, O), lambda b, i, j: (0, 0)),          # distance weight
        ],
        out_specs=(
            pl.BlockSpec((1, 1, TI), lambda b, i, j: (b, 0, i)),        # norms (revisited over j)
            pl.BlockSpec((1, TI, TJ), lambda b, i, j: (b, i, j)),       # distances
            pl.BlockSpec((1, TI, TJ * O), lambda b, i, j: (b, i, j)),   # diffs (lane-dense)
        ),
        compiler_params=pltpu.CompilerParams(
            # j is "arbitrary": the norms output block is revisited across j.
            # b and i remain "parallel" for megacore / multi-TC sharding.
            dimension_semantics=("parallel", "parallel", "arbitrary"),
            vmem_limit_bytes=40 * 1024 * 1024,
        ),
    )(x, x, wd_t, wdist_t)

    norms = norms3[:, 0, :]                            # (B, L)
    # Free reshape: (B, L, L*O) and (B, L, L, O) share the same row-major bytes.
    differences = diff_flat.reshape(B, L, L, O)
    return norms, distances, differences


def _reference_forward(x, w_depth, w_distance):
    """Pure-JAX reference mirroring the PyTorch forward exactly."""
    depths = jnp.einsum("ble,oe->blo", x, w_depth)
    norms = jnp.sum(depths * depths, axis=-1)
    dists = jnp.einsum("ble,oe->blo", x, w_distance)
    diffs = dists[:, :, None, :] - dists[:, None, :, :]
    distances = jnp.sum(diffs * diffs, axis=-1)
    return norms, distances, diffs


if __name__ == "__main__":
    # Small shapes consistent with the module: batch=2, seq=8, emb_dim=32, out_dim=32.
    B, L, E, O = 2, 8, 32, 32

    key = jax.random.PRNGKey(0)
    k_x, k_wd, k_wdist = jax.random.split(key, 3)

    emb_sentences = jax.random.normal(k_x, (B, L, E), dtype=jnp.float32)
    # torch.nn.Linear(emb_dim, out_dim, bias=False) weight shape: (out_dim, emb_dim)
    bound = 1.0 / (E ** 0.5)
    w_depth = jax.random.uniform(k_wd, (O, E), jnp.float32, -bound, bound)
    w_distance = jax.random.uniform(k_wdist, (O, E), jnp.float32, -bound, bound)

    norms, distances, differences = directed_graph_predictor_forward(
        emb_sentences, w_depth, w_distance
    )
    jax.block_until_ready((norms, distances, differences))

    # Sanity check against the pure-JAX reference.
    ref_norms, ref_distances, ref_differences = _reference_forward(
        emb_sentences, w_depth, w_distance
    )
    assert norms.shape == (B, L)
    assert distances.shape == (B, L, L)
    assert differences.shape == (B, L, L, O)
    assert jnp.allclose(norms, ref_norms, atol=1e-4, rtol=1e-4)
    assert jnp.allclose(distances, ref_distances, atol=1e-4, rtol=1e-4)
    assert jnp.allclose(differences, ref_differences, atol=1e-5, rtol=1e-5)

    print("KERNEL_OK")
</pallas_src>

<mosaic_0001>
module attributes {stable_mosaic.version = 11 : i64} {
  func.func @_predictor_kernel(%arg0: i32, %arg1: i32, %arg2: i32, %arg3: memref<1x8x32xf32, #tpu.memory_space<vmem>>, %arg4: memref<1x8x32xf32, #tpu.memory_space<vmem>>, %arg5: memref<32x32xf32, #tpu.memory_space<vmem>>, %arg6: memref<32x32xf32, #tpu.memory_space<vmem>>, %arg7: memref<1x1x8xf32, #tpu.memory_space<vmem>>, %arg8: memref<1x8x8xf32, #tpu.memory_space<vmem>>, %arg9: memref<1x8x256xf32, #tpu.memory_space<vmem>>) attributes {dimension_semantics = [#tpu.dimension_semantics<parallel>, #tpu.dimension_semantics<parallel>, #tpu.dimension_semantics<arbitrary>], iteration_bounds = array<i64: 2, 1, 1>, scalar_prefetch = 0 : i64, scratch_operands = 0 : i64, tpu.core_type = #tpu.core_type<tc>, window_params = [{transform_indices = @transform_0, window_bounds = array<i64: 1, 8, 32>}, {transform_indices = @transform_1, window_bounds = array<i64: 1, 8, 32>}, {pipeline_mode = #tpu.pipeline_mode<synchronous>, transform_indices = @transform_2, window_bounds = array<i64: 32, 32>}, {pipeline_mode = #tpu.pipeline_mode<synchronous>, transform_indices = @transform_3, window_bounds = array<i64: 32, 32>}, {transform_indices = @transform_4, window_bounds = array<i64: 1, 1, 8>}, {transform_indices = @transform_5, window_bounds = array<i64: 1, 8, 8>}, {transform_indices = @transform_6, window_bounds = array<i64: 1, 8, 256>}]} {
    %c0 = arith.constant 0 : index
    %c0_0 = arith.constant 0 : index
    %c0_1 = arith.constant 0 : index
    %0 = vector.load %arg3[%c0, %c0_0, %c0_1] : memref<1x8x32xf32, #tpu.memory_space<vmem>>, vector<1x8x32xf32>
    %1 = vector.shape_cast %0 : vector<1x8x32xf32> to vector<8x32xf32>
    %c0_2 = arith.constant 0 : index
    %c0_3 = arith.constant 0 : index
    %c0_4 = arith.constant 0 : index
    %2 = vector.load %arg4[%c0_2, %c0_3, %c0_4] : memref<1x8x32xf32, #tpu.memory_space<vmem>>, vector<1x8x32xf32>
    %3 = vector.shape_cast %2 : vector<1x8x32xf32> to vector<8x32xf32>
    %c0_5 = arith.constant 0 : index
    %c0_6 = arith.constant 0 : index
    %4 = vector.load %arg6[%c0_5, %c0_6] : memref<32x32xf32, #tpu.memory_space<vmem>>, vector<32x32xf32>
    %cst = arith.constant dense<0.000000e+00> : vector<8x32xf32>
    %5 = tpu.matmul %1, %4, %cst {dimension_numbers = #tpu.dot_dimension_numbers<[1], [0], [0], [1], [0, 0, 1, 1], [], []>} : vector<8x32xf32>, vector<32x32xf32>, vector<8x32xf32> -> vector<8x32xf32>
    %cst_7 = arith.constant dense<0.000000e+00> : vector<8x32xf32>
    %6 = tpu.matmul %3, %4, %cst_7 {dimension_numbers = #tpu.dot_dimension_numbers<[1], [0], [0], [1], [0, 0, 1, 1], [], []>} : vector<8x32xf32>, vector<32x32xf32>, vector<8x32xf32> -> vector<8x32xf32>
    %cst_8 = arith.constant 1.000000e+00 : f32
    %7 = vector.broadcast %cst_8 : f32 to vector<1x32xf32>
    %c0_i32 = arith.constant 0 : i32
    %8 = arith.cmpi eq, %arg2, %c0_i32 : i32
    %9 = arith.extui %8 : i1 to i32
    %c0_i32_9 = arith.constant 0 : i32
    %10 = arith.cmpi ne, %9, %c0_i32_9 : i32
    scf.if %10 {
      %c0_21 = arith.constant 0 : index
      %c0_22 = arith.constant 0 : index
      %56 = vector.load %arg5[%c0_21, %c0_22] : memref<32x32xf32, #tpu.memory_space<vmem>>, vector<32x32xf32>
      %cst_23 = arith.constant dense<0.000000e+00> : vector<8x32xf32>
      %57 = tpu.matmul %1, %56, %cst_23 {dimension_numbers = #tpu.dot_dimension_numbers<[1], [0], [0], [1], [0, 0, 1, 1], [], []>} : vector<8x32xf32>, vector<32x32xf32>, vector<8x32xf32> -> vector<8x32xf32>
      %58 = arith.mulf %57, %57 : vector<8x32xf32>
      %cst_24 = arith.constant dense<0.000000e+00> : vector<1x8xf32>
      %59 = tpu.matmul %7, %58, %cst_24 {dimension_numbers = #tpu.dot_dimension_numbers<[1], [1], [0], [0], [0, 0, 1, 0], [], []>} : vector<1x32xf32>, vector<8x32xf32>, vector<1x8xf32> -> vector<1x8xf32>
      %c0_25 = arith.constant 0 : index
      %c0_26 = arith.constant 0 : index
      %c0_27 = arith.constant 0 : index
      %60 = vector.load %arg7[%c0_25, %c0_26, %c0_27] : memref<1x1x8xf32, #tpu.memory_space<vmem>>, vector<1x1x8xf32>
      %61 = vector.shape_cast %60 : vector<1x1x8xf32> to vector<1x8xf32>
      %62 = vector.shape_cast %59 : vector<1x8xf32> to vector<1x1x8xf32>
      tpu.vector_store %arg7[%c0_25, %c0_26, %c0_27], %62 {strides = array<i32>} : memref<1x1x8xf32, #tpu.memory_space<vmem>>, vector<1x1x8xf32>,
    } else {
    }
    %cst_10 = arith.constant dense<0.000000e+00> : vector<8x8xf32>
    %11 = tpu.matmul %5, %6, %cst_10 {dimension_numbers = #tpu.dot_dimension_numbers<[1], [1], [0], [0], [0, 0, 1, 0], [], []>} : vector<8x32xf32>, vector<8x32xf32>, vector<8x8xf32> -> vector<8x8xf32>
    %12 = arith.mulf %5, %5 : vector<8x32xf32>
    %cst_11 = arith.constant dense<0.000000e+00> : vector<8xf32>
    %13 = vector.multi_reduction <add>, %12, %cst_11 [1] : vector<8x32xf32> to vector<8xf32>
    %14 = vector.shape_cast %13 : vector<8xf32> to vector<8x1xf32>
    %15 = arith.mulf %6, %6 : vector<8x32xf32>
    %cst_12 = arith.constant dense<0.000000e+00> : vector<1x8xf32>
    %16 = tpu.matmul %7, %15, %cst_12 {dimension_numbers = #tpu.dot_dimension_numbers<[1], [1], [0], [0], [0, 0, 1, 0], [], []>} : vector<1x32xf32>, vector<8x32xf32>, vector<1x8xf32> -> vector<1x8xf32>
    %17 = vector.broadcast %14 : vector<8x1xf32> to vector<8x8xf32>
    %18 = vector.broadcast %16 : vector<1x8xf32> to vector<8x8xf32>
    %19 = arith.addf %17, %18 : vector<8x8xf32>
    %cst_13 = arith.constant 2.000000e+00 : f32
    %20 = vector.broadcast %cst_13 : f32 to vector<8x8xf32>
    %21 = arith.mulf %20, %11 : vector<8x8xf32>
    %22 = arith.subf %19, %21 : vector<8x8xf32>
    %cst_14 = arith.constant 0.000000e+00 : f32
    %23 = vector.broadcast %cst_14 : f32 to vector<8x8xf32>
    %24 = arith.maximumf %22, %23 : vector<8x8xf32>
    %c0_15 = arith.constant 0 : index
    %c0_16 = arith.constant 0 : index
    %c0_17 = arith.constant 0 : index
    %25 = vector.load %arg8[%c0_15, %c0_16, %c0_17] : memref<1x8x8xf32, #tpu.memory_space<vmem>>, vector<1x8x8xf32>
    %26 = vector.shape_cast %25 : vector<1x8x8xf32> to vector<8x8xf32>
    %27 = vector.shape_cast %24 : vector<8x8xf32> to vector<1x8x8xf32>
    tpu.vector_store %arg8[%c0_15, %c0_16, %c0_17], %27 {strides = array<i32>} : memref<1x8x8xf32, #tpu.memory_space<vmem>>, vector<1x8x8xf32>,
    %28 = vector.extract_strided_slice %6 {offsets = [0, 0], sizes = [1, 32], strides = [1, 1]} : vector<8x32xf32> to vector<1x32xf32>
    %29 = vector.broadcast %28 : vector<1x32xf32> to vector<8x32xf32>
    %30 = arith.subf %5, %29 : vector<8x32xf32>
    %31 = vector.extract_strided_slice %6 {offsets = [1, 0], sizes = [1, 32], strides = [1, 1]} : vector<8x32xf32> to vector<1x32xf32>
    %32 = vector.broadcast %31 : vector<1x32xf32> to vector<8x32xf32>
    %33 = arith.subf %5, %32 : vector<8x32xf32>
    %34 = vector.extract_strided_slice %6 {offsets = [2, 0], sizes = [1, 32], strides = [1, 1]} : vector<8x32xf32> to vector<1x32xf32>
    %35 = vector.broadcast %34 : vector<1x32xf32> to vector<8x32xf32>
    %36 = arith.subf %5, %35 : vector<8x32xf32>
    %37 = vector.extract_strided_slice %6 {offsets = [3, 0], sizes = [1, 32], strides = [1, 1]} : vector<8x32xf32> to vector<1x32xf32>
    %38 = vector.broadcast %37 : vector<1x32xf32> to vector<8x32xf32>
    %39 = arith.subf %5, %38 : vector<8x32xf32>
    %40 = vector.extract_strided_slice %6 {offsets = [4, 0], sizes = [1, 32], strides = [1, 1]} : vector<8x32xf32> to vector<1x32xf32>
    %41 = vector.broadcast %40 : vector<1x32xf32> to vector<8x32xf32>
    %42 = arith.subf %5, %41 : vector<8x32xf32>
    %43 = vector.extract_strided_slice %6 {offsets = [5, 0], sizes = [1, 32], strides = [1, 1]} : vector<8x32xf32> to vector<1x32xf32>
    %44 = vector.broadcast %43 : vector<1x32xf32> to vector<8x32xf32>
    %45 = arith.subf %5, %44 : vector<8x32xf32>
    %46 = vector.extract_strided_slice %6 {offsets = [6, 0], sizes = [1, 32], strides = [1, 1]} : vector<8x32xf32> to vector<1x32xf32>
    %47 = vector.broadcast %46 : vector<1x32xf32> to vector<8x32xf32>
    %48 = arith.subf %5, %47 : vector<8x32xf32>
    %49 = vector.extract_strided_slice %6 {offsets = [7, 0], sizes = [1, 32], strides = [1, 1]} : vector<8x32xf32> to vector<1x32xf32>
    %50 = vector.broadcast %49 : vector<1x32xf32> to vector<8x32xf32>
    %51 = arith.subf %5, %50 : vector<8x32xf32>
    %52 = tpu.concatenate %30, %33, %36, %39, %42, %45, %48, %51 in 1 : vector<8x32xf32>, vector<8x32xf32>, vector<8x32xf32>, vector<8x32xf32>, vector<8x32xf32>, vector<8x32xf32>, vector<8x32xf32>, vector<8x32xf32> -> vector<8x256xf32>
    %c0_18 = arith.constant 0 : index
    %c0_19 = arith.constant 0 : index
    %c0_20 = arith.constant 0 : index
    %53 = vector.load %arg9[%c0_18, %c0_19, %c0_20] : memref<1x8x256xf32, #tpu.memory_space<vmem>>, vector<1x8x256xf32>
    %54 = vector.shape_cast %53 : vector<1x8x256xf32> to vector<8x256xf32>
    %55 = vector.shape_cast %52 : vector<8x256xf32> to vector<1x8x256xf32>
    tpu.vector_store %arg9[%c0_18, %c0_19, %c0_20], %55 {strides = array<i32>} : memref<1x8x256xf32, #tpu.memory_space<vmem>>, vector<1x8x256xf32>,
    return
  }
  func.func @transform_0(%arg0: i32, %arg1: i32, %arg2: i32) -> (i32, i32, i32) {
    %c0_i32 = arith.constant 0 : i32
    %c0_i32_0 = arith.constant 0 : i32
    return %arg0, %arg1, %c0_i32 : i32, i32, i32
  }
  func.func @transform_1(%arg0: i32, %arg1: i32, %arg2: i32) -> (i32, i32, i32) {
    %c0_i32 = arith.constant 0 : i32
    %c0_i32_0 = arith.constant 0 : i32
    return %arg0, %arg2, %c0_i32 : i32, i32, i32
  }
  func.func @transform_2(%arg0: i32, %arg1: i32, %arg2: i32) -> (i32, i32) {
    %c0_i32 = arith.constant 0 : i32
    %c0_i32_0 = arith.constant 0 : i32
    %c0_i32_1 = arith.constant 0 : i32
    return %c0_i32, %c0_i32_0 : i32, i32
  }
  func.func @transform_3(%arg0: i32, %arg1: i32, %arg2: i32) -> (i32, i32) {
    %c0_i32 = arith.constant 0 : i32
    %c0_i32_0 = arith.constant 0 : i32
    %c0_i32_1 = arith.constant 0 : i32
    return %c0_i32, %c0_i32_0 : i32, i32
  }
  func.func @transform_4(%arg0: i32, %arg1: i32, %arg2: i32) -> (i32, i32, i32) {
    %c0_i32 = arith.constant 0 : i32
    %c0_i32_0 = arith.constant 0 : i32
    return %arg0, %c0_i32, %arg1 : i32, i32, i32
  }
  func.func @transform_5(%arg0: i32, %arg1: i32, %arg2: i32) -> (i32, i32, i32) {
    %c0_i32 = arith.constant 0 : i32
    return %arg0, %arg1, %arg2 : i32, i32, i32
  }
  func.func @transform_6(%arg0: i32, %arg1: i32, %arg2: i32) -> (i32, i32, i32) {
    %c0_i32 = arith.constant 0 : i32
    return %arg0, %arg1, %arg2 : i32, i32, i32
  }
}

</mosaic_0001>

<bundles_post_ra>
// kernel: tpu_custom_call.1
= control target key start
LH: loop header
LB: loop body
LE: loop exit
PB: predicated region body
PF: predicated region fallthrough
CT: control target
= control target key end

     0   :  { %s2158_s0 = inlined_call_operand.hbm [shape: f32[2,8,32], index: 0, kind: input, shape index: {}]   ;;  %s2159_s1 = inlined_call_operand.hbm [shape: f32[2,8,32], index: 1, kind: input, shape index: {}]   ;;  %s2160_s2 = inlined_call_operand.hbm [shape: f32[32,32], index: 2, kind: input, shape index: {}]   ;;  %s2161_s3 = inlined_call_operand.hbm [shape: f32[32,32], index: 3, kind: input, shape index: {}]   ;;  %s2162_s4 = inlined_call_operand.hbm [shape: f32[2,1,8], index: 4, kind: output, shape index: {0}]   ;;  %s2163_s5 = inlined_call_operand.hbm [shape: f32[2,8,8], index: 5, kind: output, shape index: {1}]   ;;  %s2164_s6 = inlined_call_operand.hbm [shape: f32[2,8,256], index: 6, kind: output, shape index: {2}]  }
   0x1   :  { %2172 = sst [smem:[#allocation23_spill]] %s2160_s2 }
   0x2   :  { %2173 = sst [smem:[#allocation24_spill]] %s2161_s3 }
   0x3   :  { %12 = vsyncpa [#allocation3], 0 }
   0x4   :  { %14 = vsyncpa [#allocation3 + $0x1], 0 }
   0x5   :  { %15 = vsyncpa [#allocation6], 0 }
   0x6   :  { %17 = vsyncpa [#allocation6 + $0x1], 0 }
   0x7   :  { %18 = vsyncpa [#allocation9], 0 }
   0x8   :  { %19 = vsyncpa [#allocation4], 0 }
   0x9   :  { %21 = vsyncpa [#allocation4 + $0x1], 0 }
   0xa   :  { %22 = vsyncpa [#allocation12], 0 }
   0xb   :  { %24 = vsyncpa [#allocation12 + $0x1], 0  ;;  %s1736_s21 = smov 0   ;;  %s1738_s22 = smov 0  }
   0xc   :  { %s1740_s23 = smov 0   ;;  %s1742_s24 = smov 0  }
   0xd   :  { %s1744_s25 = smov 0   ;;  %s1746_s26 = smov 0  }
   0xe LB: > { %2174 = sst [smem:[#allocation20_spill]] %s1679_s25  ;;  %s1767_s27 = sadd.s32 4294967295, %s1683_s26   ;;  %s1683_s26 = sphi %s1746_s26, %s30_s26   ;;  %s1679_s25 = sphi %s1744_s25, %s2198_s25   ;;  %s1675_s24 = sphi %s1742_s24, %s2197_s24   ;;  %s1671_s23 = sphi %s1740_s23, %s2201_s23   ;;  %s1667_s22 = sphi %s1738_s22, %s2200_s22   ;;  %s1663_s21 = sphi %s1736_s21, %s2199_s21  }
   0xf   : > { %s2166_s28 = sadd.s32 4294967294, %s1683_s26   ;;  %p71_p0 = scmp.ne.s32.totalorder %s1667_s22, %s1663_s21 }
  0x10   : > { %p2165_p1 = scmp.eq.s32.totalorder %s1767_s27, 0  ;;  %p173_p3 = scmp.eq.s32.totalorder %s2166_s28, 1 }
  0x11   : > { %p1186_p5 = scmp.ge.s32.totalorder %s1683_s26, 1  ;;  %p240_p7 = scmp.lt.s32.totalorder %s1683_s26, 3 }
  0x12   : > { %p1778_p4 = por %p2165_p1, %p71_p0  ;;  %p1783_p6 = por %p173_p3, %p71_p0 }
  0x13   : > { %p1788_p8 = pnand %p1186_p5, %p240_p7  ;;  %s1685_s8 = smov [#allocation7]  }
  0x14   : > { %s2175_s29 = scalar_select %p1778_p4, 1, 0 }
  0x15   : > { %s2176_s30 = scalar_select %p1783_p6, 1, 0 }
  0x16   : > { %s2177_s7 = scalar_select %p1788_p8, 1, 0 }
  0x17   : > { %s252_s9 = sshll.u32 %s1685_s8, 4  ;;  %p1324_p9 = pneg %p1788_p8  ;;  %s1792_s9 = int_to_ptr.vmem [resolvable:$true] %s252_s9 }
  0x18   : > { %s1686_s11 = smov [#allocation8]   ;;  %s2179_s2 = sld [smem:[#allocation23_spill]] }
  0x19   : > { %p1799_p11 = pnand %p1324_p9, %p2165_p1  ;;  %s265_s12 = sshll.u32 %s1686_s11, 4  ;;  %s1803_s12 = int_to_ptr.vmem [resolvable:$true] %s265_s12 }
  0x1b   : > { %p1415_p13 = pneg %p1799_p11 }
  0x1e   : > { %s1413_s15 = scalar_lea.hbm %s2179_s2, 512 }
  0x1f   : > { %p1414_p12 = scmp.ne.s32.totalorder %s2179_s2, %s1413_s15  ;;  %p1420_p5 = scmp.lt.u32.totalorder %s1413_s15, %s2179_s2 }
  0x21   : > { %p1416_p0 = pnand %p1415_p13, %p1414_p12 }
  0x23   : > { %p1417_p3 = pneg %p1416_p0 }
  0x25   : > { %p1422_p7 = pnand %p1420_p5, %p1417_p3 }
  0x27   : > { %1425 = shalt.err (!%p1422_p7)
}
  0x28   : > { %s1426_s20 = scalar_lea.vmem %s1792_s9, 512  ;;  %p1434_p2 = scmp.lt.s32.totalorder %s1792_s9, %s1792_s9 }
  0x29   : > { %p1427_p9 = scmp.ne.s32.totalorder %s1792_s9, %s1426_s20  ;;  %p1435_p12 = scmp.lt.s32.totalorder %s1426_s20, %s1426_s20 }
  0x2b   : > { %p1429_p10 = pnand %p1427_p9, %p1415_p13  ;;  %p1436_p0 = por %p1435_p12, %p1434_p2 }
  0x2d   : > { %p1430_p1 = pneg %p1429_p10 }
  0x2f   : > { %p1437_p6 = pnand %p1436_p0, %p1430_p1 }
  0x31   : > { %1440 = shalt.err (!%p1437_p6)
}
  0x32   : > { %s1687_s8 = smov 128   ;;  %s1688_s11 = smov 8  }
  0x33   : > { %1327 = dma.hbm_to_vmem [thread:$0]  (!%p1799_p11), %s2179_s2, 512, %s1792_s9, [#allocation6], %s1687_s8, %s1687_s8, %s1688_s11  }
  0x34   : > { %s2180_s3 = sld [smem:[#allocation24_spill]] }
  0x3a   : > { %s1441_s17 = scalar_lea.hbm %s2180_s3, 512 }
  0x3b   : > { %p1442_p2 = scmp.ne.s32.totalorder %s2180_s3, %s1441_s17  ;;  %p1448_p10 = scmp.lt.u32.totalorder %s1441_s17, %s2180_s3 }
  0x3d   : > { %p1444_p1 = pnand %p1442_p2, %p1415_p13 }
  0x3f   : > { %p1445_p6 = pneg %p1444_p1 }
  0x41   : > { %p1450_p3 = pnand %p1448_p10, %p1445_p6 }
  0x43   : > { %1453 = shalt.err (!%p1450_p3)
}
  0x44   : > { %s1454_s9 = scalar_lea.vmem %s1803_s12, 512  ;;  %p1462_p12 = scmp.lt.s32.totalorder %s1803_s12, %s1803_s12 }
  0x45   : > { %p1455_p5 = scmp.ne.s32.totalorder %s1803_s12, %s1454_s9  ;;  %p1463_p0 = scmp.lt.s32.totalorder %s1454_s9, %s1454_s9 }
  0x47   : > { %p1457_p7 = pnand %p1455_p5, %p1415_p13  ;;  %p1464_p2 = por %p1463_p0, %p1462_p12 }
  0x49   : > { %p1458_p9 = pneg %p1457_p7 }
  0x4b   : > { %p1465_p1 = pnand %p1464_p2, %p1458_p9 }
  0x4d   : > { %1468 = shalt.err (!%p1465_p1)
}
  0x4e   : > { %1330 = dma.hbm_to_vmem [thread:$0]  (!%p1799_p11), %s2180_s3, 512, %s1803_s12, [#allocation9], %s1687_s8, %s1687_s8, %s1688_s11  }
  0x4f   : > { %s49_s14 = sadd.s32 1, %s1679_s25  ;;  %s58_s15 = sadd.s32 1, %s1671_s23 }
  0x50   : > { %p51_p13 = scmp.ge.s32.totalorder %s49_s14, 2  ;;  %p65_p6 = scmp.ne.s32.totalorder %s1671_s23, %s1667_s22 }
  0x51   : > { %p66_p10 = scmp.eq.s32.totalorder %s1683_s26, 0  ;;  %p1350_p3 = scmp.lt.s32.totalorder %s1683_s26, 2 }
  0x52   : > { %s2203_s14 = smov (%p51_p13, %s49_s14), 0  ;;  %p2182_p7 = scmp.eq.s32.totalorder %s1767_s27, 1 }
  0x53   : > { %2181 = sst [smem:[#allocation21_spill]] %s2203_s14  ;;  %p67_p5 = por %p66_p10, %p65_p6 }
  0x54   : > { %p1867_p9 = por %p2182_p7, %p65_p6  ;;  %s53_s16 = ssub.s32 %s1679_s25, %s2203_s14 }
  0x55   : > { %s279_s17 = sand.u32 1, %s1671_s23   ;;  %p56_p12 = scmp.eq.s32.totalorder %s53_s16, 0 }
  0x56   : > { %s2183_s10 = scalar_select %p1867_p9, 1, 0 }
  0x57   : > { %s1874_s12 = sshll.u32 %s279_s17, 3  ;;  %s1191_s8 = sshll.u32 %s1679_s25, 7 }
  0x58   : > { %s1878_s11 = scalar_select %p56_p12, %s1671_s23, %s58_s15  }
  0x59   : > { %s1883_s20 = scalar_lea.hbm %s2158_s0, %s1191_s8  ;;  %s283_s9 = scalar_lea.vmem [#allocation2], %s1874_s12 }
  0x5a   : > { %2184 = sst [smem:[#allocation22_spill]] %s1878_s11  ;;  %s291_s28 = sshll.u32 %s283_s9, 4  ;;  %s1892_s28 = int_to_ptr.vmem [resolvable:$true] %s291_s28 }
  0x5b   : > { %p1888_p11 = pnand %p1350_p3, %p67_p5  ;;  %s1897_s18 = scalar_lea.hbm %s2159_s1, %s1191_s8 }
  0x5c   : > { %s280_s19 = scalar_lea.sflag [#allocation3], %s279_s17  ;;  %s1469_s2 = scalar_lea.hbm %s1883_s20, 128 }
  0x5d   : > { %p1470_p0 = scmp.ne.s32.totalorder %s1883_s20, %s1469_s2  ;;  %p1471_p2 = pneg %p1888_p11 }
  0x5e   : > { %s1474_s14 = scalar_lea.hbm %s2158_s0, 256  ;;  %p1475_p6 = scmp.lt.u32.totalorder %s1883_s20, %s2158_s0 }
  0x5f   : > { %p1472_p1 = pnand %p1471_p2, %p1470_p0  ;;  %p1476_p10 = scmp.lt.u32.totalorder %s1474_s14, %s1469_s2 }
  0x60   : > { %p1478_p5 = scmp.lt.u32.totalorder %s1469_s2, %s1883_s20 }
  0x61   : > { %p1473_p13 = pneg %p1472_p1  ;;  %p1477_p3 = por %p1476_p10, %p1475_p6 }
  0x63   : > { %p1479_p7 = por %p1478_p5, %p1477_p3 }
  0x65   : > { %p1480_p12 = pnand %p1479_p7, %p1473_p13 }
  0x67   : > { %1483 = shalt.err (!%p1480_p12)
}
  0x68   : > { %s1484_s17 = scalar_lea.vmem %s1892_s28, 128  ;;  %s1689_s3 = smov [#allocation2]  }
  0x69   : > { %p1485_p0 = scmp.ne.s32.totalorder %s1892_s28, %s1484_s17  ;;  %s1489_s8 = sshll.u32 %s1689_s3, 4  ;;  %s1490_s8 = int_to_ptr.vmem [resolvable:$false] %s1489_s8 }
  0x6a   : > { %s1491_s25 = scalar_lea.vmem %s1490_s8, 256  ;;  %p1492_p4 = scmp.lt.s32.totalorder %s1892_s28, %s1490_s8 }
  0x6b   : > { %p1487_p1 = pnand %p1485_p0, %p1471_p2  ;;  %p1493_p6 = scmp.lt.s32.totalorder %s1491_s25, %s1484_s17 }
  0x6d   : > { %p1488_p9 = pneg %p1487_p1  ;;  %p1494_p10 = por %p1493_p6, %p1492_p4 }
  0x6f   : > { %p1495_p3 = pnand %p1494_p10, %p1488_p9 }
  0x71   : > { %1498 = shalt.err (!%p1495_p3)
}
  0x72   : > { %1334 = dma.hbm_to_vmem [thread:$0]  (!%p1888_p11), %s1883_s20, 128, %s1892_s28, %s280_s19  }
  0x73   : > { %s298_s2 = sand.u32 1, %s1683_s26   ;;  %s302_s14 = scalar_lea.vmem [#allocation5], %s1874_s12 }
  0x74   : > { %s310_s11 = sshll.u32 %s302_s14, 4  ;;  %s299_s15 = scalar_lea.sflag [#allocation6], %s298_s2  ;;  %s311_s11 = int_to_ptr.vmem [resolvable:$true] %s310_s11 }
  0x75   : > { %s1499_s16 = scalar_lea.hbm %s1897_s18, 128  ;;  %s1504_s3 = scalar_lea.hbm %s2159_s1, 256 }
  0x76   : > { %p1500_p4 = scmp.ne.s32.totalorder %s1897_s18, %s1499_s16  ;;  %p1505_p5 = scmp.lt.u32.totalorder %s1897_s18, %s2159_s1 }
  0x77   : > { %p1506_p7 = scmp.lt.u32.totalorder %s1504_s3, %s1499_s16  ;;  %p1508_p0 = scmp.lt.u32.totalorder %s1499_s16, %s1897_s18 }
  0x78   : > { %p1502_p9 = pnand %p1500_p4, %p1471_p2 }
  0x79   : > { %p1507_p12 = por %p1506_p7, %p1505_p5 }
  0x7a   : > { %p1503_p13 = pneg %p1502_p9 }
  0x7b   : > { %p1509_p1 = por %p1508_p0, %p1507_p12 }
  0x7d   : > { %p1510_p6 = pnand %p1509_p1, %p1503_p13 }
  0x7f   : > { %1513 = shalt.err (!%p1510_p6)
}
  0x80   : > { %s1514_s12 = scalar_lea.vmem %s311_s11, 128  ;;  %s1690_s20 = smov [#allocation5]  }
  0x81   : > { %p1515_p10 = scmp.ne.s32.totalorder %s311_s11, %s1514_s12  ;;  %s1519_s28 = sshll.u32 %s1690_s20, 4  ;;  %s1520_s28 = int_to_ptr.vmem [resolvable:$false] %s1519_s28 }
  0x82   : > { %s1521_s19 = scalar_lea.vmem %s1520_s28, 256  ;;  %p1522_p9 = scmp.lt.s32.totalorder %s311_s11, %s1520_s28 }
  0x83   : > { %p1517_p3 = pnand %p1515_p10, %p1471_p2  ;;  %p1523_p8 = scmp.lt.s32.totalorder %s1521_s19, %s1514_s12 }
  0x85   : > { %p1518_p4 = pneg %p1517_p3  ;;  %p1524_p5 = por %p1523_p8, %p1522_p9 }
  0x87   : > { %p1525_p7 = pnand %p1524_p5, %p1518_p4 }
  0x89   : > { %1528 = shalt.err (!%p1525_p7)
}
  0x8a   : > { %1337 = dma.hbm_to_vmem [thread:$0]  (!%p1888_p11), %s1897_s18, 128, %s311_s11, %s299_s15  }
  0x8b   : > { %p2186_p13 = scmp.ne.s32.totalorder %s2177_s7, 0 }
  0x8c   : > { %s1948_s2 = sand.u32 (!%p2186_p13), 1, %s1667_s22   ;;  %p2187_p8 = scmp.ne.s32.totalorder (!%p2186_p13), %s2175_s29, 0 }
  0x8d   : > { %319 = sbr.rel (%p2186_p13) target bundleno = 669 (0x29d), region = 36  ;;  %s1951_s14 = sshll.u32 (!%p2186_p13), %s1948_s2, 3 }
  0x8e   : > { %s322_s16 = scalar_lea.sflag (!%p2186_p13), [#allocation3], %s1948_s2  ;;  %s325_s9 = scalar_lea.vmem (!%p2186_p13), [#allocation2], %s1951_s14 }
  0x94   : > { %1638 = dma.done.wait (%p2187_p8), %s322_s16, 128  }
  0x95   : > { %1640 = vsyncadd (%p2187_p8), %s322_s16, 4294967168  ;;  %s330_s7 = sand.u32 1, %s1767_s27   ;;  %s334_s18 = scalar_lea.vmem [#allocation5], %s1951_s14 }
  0x96   : > { %s331_s13 = scalar_lea.sflag [#allocation6], %s330_s7 }
  0x97   : > { %1642 = dma.done.wait (%p2187_p8), %s331_s13, 128  }
  0x98   : > { %1644 = vsyncadd (%p2187_p8), %s331_s13, 4294967168  ;;  %p2188_p11 = scmp.eq.s32.totalorder %s1767_s27, 0 }
  0x9a   : > { %1646 = dma.done.wait (%p2188_p11), [#allocation6], 512   ;;  %p2189_p2 = pmov %p2188_p11 }
  0x9c   : > { %1648 = vsyncadd (%p2189_p2), [#allocation6], 4294966784  ;;  %p2190_p12 = pmov %p2189_p2 }
  0x9d   : > { %p2191_p0 = pmov %p2189_p2 }
  0x9e   : > { %1650 = dma.done.wait (%p2190_p12), [#allocation9], 512  }
  0x9f   : > { %1652 = vsyncadd (%p2191_p0), [#allocation9], 4294966784  ;;  %v1691_v0 = vmov 0.0|0.0   ;;  %vm1692_vm0 = vmmov 0   ;;  %v1693_v1 = vmov 0.0   ;;  %v388_v2 = vld [vmem:[#allocation8] sm:$0xff]  ;;  %v853_v16 = vlaneseq }
  0xa0   : > { %1288 = vmatprep.subr.bf16.mxu0 %v1691_v0  ;;  %1294 = vmatprep.subr.bf16.mxu1 %v1691_v0  ;;  %v389_v3 = vld [vmem:[#allocation8 + $0x8] sm:$0xff]  ;;  %v390_v4 = vld [vmem:[#allocation8 + $0x10] sm:$0xff]  ;;  %v391_v6 = vld [vmem:[#allocation8 + $0x18] sm:$0xff]  ;;  %vm392_vm1 = vcmask 261120   ;;  %s1694_s29 = smov 32   ;;  %v1695_v48 = vmov 1.0  }
  0xa1   : > { %1248 = vmatprep.mubr.msk.f32.mxu0 %vm1692_vm0, %v1693_v1  ;;  %1259 = vmatprep.mubr.msk.f32.mxu1 %vm1692_vm0, %v1693_v1  ;;  %v1289_v5 = vpack.c.bf16 %v389_v3, %v388_v2  ;;  %v1292_v7 = vpack.c.bf16 %v391_v6, %v390_v4  ;;  %v543_v8 = vld [vmem:[#allocation7] sm:$0xff]  ;;  %v544_v9 = vld [vmem:[#allocation7 + $0x8] sm:$0xff]  ;;  %v387_v11 = vld [vmem:[%s334_s18] sm:$0xff]  ;;  %v1992_v17 = vshrl.u32 %v853_v16, 7  ;;  %s1696_s11 = smov 64   ;;  %s1697_s15 = smov 96  }
  0xa2   : > { %v386_v10 = vld [vmem:[%s325_s9] sm:$0xff]  ;;  %v1301_v12 = vpack.c.bf16 %v544_v9, %v543_v8  ;;  %v545_v13 = vld [vmem:[#allocation7 + $0x10] sm:$0xff]  ;;  %v546_v14 = vld [vmem:[#allocation7 + $0x18] sm:$0xff]  ;;  %s1200_s17 = sshll.u32 %s1948_s2, 4  ;;  %vm928_vm2 = vcmask 523264   ;;  %vm930_vm3 = vcmask 785408  }
  0xa3   : > { %1290 = vmatpush3.bf16.msra.mxu0 %v1289_v5  ;;  %1296 = vmatpush3.bf16.msra.mxu1 %v1289_v5  ;;  %v1304_v15 = vpack.c.bf16 %v546_v14, %v545_v13  ;;  %v890_v18 = vsub.s32 5, %v1992_v17  ;;  %v875_v19 = vsub.s32 2, %v1992_v17  ;;  %v895_v20 = vsub.s32 6, %v1992_v17  ;;  %s2029_s3 = scalar_lea.vmem [#allocation13], %s1200_s17  ;;  %s1212_s8 = sshll.u32 %s1675_s24, 4 }
  0xa4   : > { %1291 = vmatprep.subr.bf16.mxu0 %v1691_v0  ;;  %1297 = vmatprep.subr.bf16.mxu1 %v1691_v0  ;;  %v880_v21 = vsub.s32 3, %v1992_v17  ;;  %v900_v22 = vsub.s32 7, %v1992_v17  ;;  %v870_v23 = vsub.s32 1, %v1992_v17  ;;  %v885_v24 = vsub.s32 4, %v1992_v17  ;;  %s370_s25 = scalar_lea.vmem [#allocation10], %s1948_s2  ;;  %s2039_s19 = scalar_lea.hbm %s2162_s4, %s1212_s8 }
  0xa5   : > { %v855_v27 = vsub.s32 0, %v1992_v17  ;;  %s961_s12 = sshll.u32 %s370_s25, 4  ;;  %vm694_vm4 = vcmask 57344   ;;  %s938_s16 = scalar_lea.sflag [#allocation4], %s1948_s2  ;;  %s2041_s12 = int_to_ptr.vmem [resolvable:$true] %s961_s12 }
  0xa6   : > { %s1529_s9 = scalar_lea.vmem %s2041_s12, 16  ;;  %p2192_p6 = scmp.ne.s32.totalorder %s2183_s10, 0 }
  0xa7   : > { %1293 = vmatpush3.bf16.msra.mxu0 %v1292_v7  ;;  %1299 = vmatpush3.bf16.msra.mxu1 %v1292_v7  ;;  %p1530_p1 = scmp.ne.s32.totalorder %s2041_s12, %s1529_s9  ;;  %s1698_s13 = smov [#allocation10]  }
  0xa8   : > { %1300 = vmatprep.subr.bf16.mxu0 %v1691_v0  ;;  %1273 = vmatprep.subr.mxu1 %v1693_v1  ;;  %s1533_s18 = sshll.u32 %s1698_s13, 4  ;;  %s1534_s18 = int_to_ptr.vmem [resolvable:$false] %s1533_s18 }
  0xa9   : > { %p1531_p10 = pnand %p1530_p1, %p2192_p6  ;;  %p1536_p4 = scmp.lt.s32.totalorder %s2041_s12, %s1534_s18 }
  0xaa   : > { %1249 = vmatmul.mubr.msk.f32.vlgmr.msra.gmra.mrb[0].mxu0 %vm392_vm1, %v386_v10  ;;  %1260 = vmatmul.mubr.msk.f32.vlgmr.msra.gmra.mrb[0].mxu1 %vm392_vm1, %v387_v11 }
  0xab   : > { %1302 = vmatpush3.bf16.msra.mxu0 %v1301_v12  ;;  %1270 = vmatprep.mubr.msk.f32.mxu0 %vm1692_vm0, %v1693_v1  ;;  %p1532_p3 = pneg %p1531_p10 }
  0xac   : > { %1303 = vmatprep.subr.bf16.mxu0 %v1691_v0  ;;  %1275 = vmatprep.mubr.msk.f32.mxu1 %vm1692_vm0, %v1693_v1 }
  0xaf   : > { %1305 = vmatpush3.bf16.msra.mxu0 %v1304_v15 }
  0xb0   : > { %1283 = vmatprep.subr.mxu0 %v1693_v1 }
  0xb2   : > { %1271 = vmatmul.mubr.msk.f32.vlgmr.msra.gmra.mrb[2].mxu0 %vm392_vm1, %v386_v10 }
  0xb3   : > { %1285 = vmatprep.mubr.msk.f32.mxu0 %vm1692_vm0, %v1693_v1 }
 0x17d   : > { %v2001_v25 = vpop.f32.mrb[0].mxu0  ;;  %v535_v26 = vpop.f32.mrb[0].mxu1 }
 0x17e   : > { %v1250_v28 = vpop.f32.mrb[1].mxu0  ;;  %v776_v29 = vmul.f32 %v535_v26, %v535_v26  ;;  %v772_v30 = vmul.f32 %v2001_v25, %v2001_v25  ;;  %v891_v31 = vrot.slane %v535_v26, %v890_v18  ;;  %v876_v32 = vrot.slane %v535_v26, %v875_v19  ;;  %v1261_v33 = vpop.f32.mrb[1].mxu1 }
 0x17f   : > { %v896_v34 = vrot.slane %v535_v26, %v895_v20  ;;  %v881_v35 = vrot.slane %v535_v26, %v880_v21  ;;  %v901_v36 = vrot.slane %v535_v26, %v900_v22  ;;  %v871_v37 = vrot.slane %v535_v26, %v870_v23 }
 0x180   : > { %1284 = vmatpush3.xpose.msk.msra.mxu0 %vm392_vm1, %v776_v29  ;;  %v773_v38 = vsel %vm392_vm1, %v772_v30, 0.0  ;;  %v892_v39 = vsub.f32 %v2001_v25, %v891_v31  ;;  %v877_v40 = vsub.f32 %v2001_v25, %v876_v32  ;;  %v886_v41 = vrot.slane %v535_v26, %v885_v24 }
 0x181   : > { %774 = vadd.xlane.f32.xlu0 %v773_v38  ;;  %v897_v42 = vsub.f32 %v2001_v25, %v896_v34  ;;  %v882_v43 = vsub.f32 %v2001_v25, %v881_v35  ;;  %v902_v44 = vsub.f32 %v2001_v25, %v901_v36  ;;  %v872_v45 = vsub.f32 %v2001_v25, %v871_v37 }
 0x182   : > { %916 = vrot.lane.b32.xlu1 %v892_v39, %s1694_s29  ;;  %v887_v46 = vsub.f32 %v2001_v25, %v886_v41  ;;  %v866_v47 = vrot.slane %v535_v26, %v855_v27 }
 0x183   : > { %1286 = vmatmul.mubr.msk.f32.vlgmr.msra.gmra.mrb[4].mxu0 %vm392_vm1, %v1695_v48 }
 0x184   : > { %v867_v49 = vsub.f32 %v2001_v25, %v866_v47 }
 0x185   : > { %v613_v50 = vpop.f32.mrb[2].mxu0 }
 0x186   : > { %v617_v51 = vmul.f32 %v613_v50, %v613_v50  ;;  %908 = vrot.lane.b32.xlu1 %v877_v40, %s1696_s11  ;;  %v1272_v52 = vpop.f32.mrb[3].mxu0 }
 0x188   : > { %1274 = vmatpush3.xpose.msk.msra.mxu1 %vm392_vm1, %v617_v51 }
 0x189   : > { %1278 = vmatprep.subr.mxu1 %v1693_v1 }
 0x18a   : > { %920 = vrot.lane.b32.xlu1 %v897_v42, %s1696_s11 }
 0x18b   : > { %1276 = vmatmul.mubr.msk.f32.vlgmr.msra.gmra.mrb[2].mxu1 %vm392_vm1, %v1695_v48 }
 0x18c   : > { %1279 = vmatpush3.xpose.msk.msra.mxu1 %vm392_vm1, %v535_v26  ;;  %1280 = vmatprep.mubr.msk.f32.mxu1 %vm1692_vm0, %v1693_v1 }
 0x18e   : > { %912 = vrot.lane.b32.xlu1 %v882_v43, %s1697_s15 }
 0x18f   : > { %1281 = vmatmul.mubr.msk.f32.vlgmr.msra.gmra.mrb[4].mxu1 %vm392_vm1, %v2001_v25 }
 0x192   : > { %924 = vrot.lane.b32.xlu1 %v902_v44, %s1697_s15 }
 0x197   : > { %904 = vrot.lane.b32.xlu0 %v872_v45, %s1694_s29  ;;  %s1535_s29 = scalar_lea.vmem %s1534_s18, 32 }
 0x198   : > { %p1537_p9 = scmp.lt.s32.totalorder %s1535_s29, %s1529_s9 }
 0x19a   : > { %p1538_p5 = por %p1537_p9, %p1536_p4 }
 0x19c   : > { %p1539_p7 = pnand %p1538_p5, %p1532_p3 }
 0x1f4   : > { %v917_v53 = vpop.permute.xlu1 %916 }
 0x1f5   : > { %v932_v57 = vsel %vm392_vm1, %v887_v46, %v917_v53 }
 0x1f8   : > { %v909_v54 = vpop.permute.xlu1 %908 }
 0x1fc   : > { %v921_v55 = vpop.permute.xlu1 %920 }
 0x1fd   : > { %v933_v58 = vsel %vm928_vm2, %v932_v57, %v921_v55 }
 0x200   : > { %v913_v56 = vpop.permute.xlu1 %912 }
 0x204   : > { %v925_v59 = vpop.permute.xlu1 %924 }
 0x205   : > { %v934_v60 = vsel %vm930_vm3, %v933_v58, %v925_v59 }
 0x206   : > { %936 = vst [vmem:[%s2029_s3 + $0x8] sm:$0xff] %v934_v60 }
 0x20e   : > { %v775_v61 = vpop.xlane.xlu0 %774 }
 0x212   : > { %v905_v62 = vpop.permute.xlu0 %904 }
 0x213   : > { %v927_v63 = vsel %vm392_vm1, %v867_v49, %v905_v62 }
 0x214   : > { %v929_v0 = vsel %vm928_vm2, %v927_v63, %v909_v54 }
 0x215   : > { %v931_v1 = vsel %vm930_vm3, %v929_v0, %v913_v56 }
 0x216   : > { %935 = vst [vmem:[%s2029_s3] sm:$0xff] %v931_v1 }
 0x256   : > { %v849_v2 = vpop.f32.mrb[4].mxu0 }
 0x257   : > { %v1287_v3 = vpop.f32.mrb[5].mxu0  ;;  %v856_v5 = vrot.slane %v849_v2, %v855_v27 }
 0x25e   : > { %v690_v4 = vpop.f32.mrb[2].mxu1 }
 0x25f   : > { %695 = vst.msk [vmem:[%s370_s25] sm:$0x1] %vm694_vm4, %v690_v4  ;;  %v1277_v6 = vpop.f32.mrb[3].mxu1 }
 0x260   : > { %1542 = shalt.err (!%p1539_p7)
}
 0x261   : > { %s1543_s2 = scalar_lea.hbm %s2039_s19, 16  ;;  %s1547_s17 = scalar_lea.hbm %s2162_s4, 32 }
 0x262   : > { %p1544_p13 = scmp.ne.s32.totalorder %s2039_s19, %s1543_s2  ;;  %p1548_p2 = scmp.lt.u32.totalorder %s2039_s19, %s2162_s4 }
 0x263   : > { %p1549_p12 = scmp.lt.u32.totalorder %s1547_s17, %s1543_s2  ;;  %p1551_p1 = scmp.lt.u32.totalorder %s1543_s2, %s2039_s19 }
 0x264   : > { %p1545_p8 = pnand %p1544_p13, %p2192_p6 }
 0x265   : > { %p1550_p0 = por %p1549_p12, %p1548_p2 }
 0x266   : > { %p1546_p11 = pneg %p1545_p8 }
 0x267   : > { %p1552_p10 = por %p1551_p1, %p1550_p0 }
 0x269   : > { %p1553_p3 = pnand %p1552_p10, %p1546_p11 }
 0x26b   : > { %1556 = shalt.err (!%p1553_p3)
}
 0x26c   : > { %1318 = dma.vmem_to_hbm [thread:$0]  (%p2192_p6), %s2041_s12, 16, %s2039_s19, %s938_s16   ;;  %v768_v7 = vpop.f32.mrb[4].mxu1  ;;  %v857_v8 = vadd.f32 %v856_v5, %v775_v61  ;;  %vm861_vm5 = vcmask 64512  }
 0x26d   : > { %v858_v9 = vmul.f32 2.0, %v768_v7  ;;  %v1282_v10 = vpop.f32.mrb[5].mxu1  ;;  %s1213_s20 = sshll.u32 %s1675_s24, 7  ;;  %s377_s28 = scalar_lea.vmem [#allocation11], %s1951_s14 }
 0x26e   : > { %s976_s9 = sshll.u32 %s377_s28, 4  ;;  %s994_s13 = sshll.u32 %s2029_s3, 4  ;;  %s2076_s9 = int_to_ptr.vmem [resolvable:$true] %s976_s9  ;;  %s2078_s13 = int_to_ptr.vmem [resolvable:$true] %s994_s13 }
 0x26f   : > { %v859_v11 = vsub.f32 %v857_v8, %v858_v9  ;;  %s1218_s18 = sshll.u32 %s1675_s24, 8  ;;  %s2074_s11 = scalar_lea.hbm %s2163_s5, %s1213_s20 }
 0x270   : > { %s2083_s3 = scalar_lea.hbm %s2164_s6, %s1218_s18  ;;  %s2087_s24 = scalar_lea.sflag [#allocation12], %s330_s7 }
 0x271   : > { %v860_v12 = vmax.f32 %v859_v11, 0.0  ;;  %s1557_s19 = scalar_lea.vmem %s2076_s9, 128  ;;  %s1699_s16 = smov [#allocation11]  }
 0x272   : > { %p1558_p4 = scmp.ne.s32.totalorder %s2076_s9, %s1557_s19  ;;  %s1561_s15 = sshll.u32 %s1699_s16, 4  ;;  %s1562_s15 = int_to_ptr.vmem [resolvable:$false] %s1561_s15 }
 0x273   : > { %862 = vst.msk [vmem:[%s377_s28] sm:$0xff] %vm861_vm5, %v860_v12  ;;  %s1563_s17 = scalar_lea.vmem %s1562_s15, 256  ;;  %p1564_p7 = scmp.lt.s32.totalorder %s2076_s9, %s1562_s15 }
 0x274   : > { %p1559_p9 = pnand %p1558_p4, %p2192_p6  ;;  %p1565_p13 = scmp.lt.s32.totalorder %s1563_s17, %s1557_s19 }
 0x276   : > { %p1560_p5 = pneg %p1559_p9  ;;  %p1566_p8 = por %p1565_p13, %p1564_p7 }
 0x278   : > { %p1567_p11 = pnand %p1566_p8, %p1560_p5 }
 0x27a   : > { %1570 = shalt.err (!%p1567_p11)
}
 0x27b   : > { %s1571_s27 = scalar_lea.hbm %s2074_s11, 128  ;;  %s1575_s25 = scalar_lea.hbm %s2163_s5, 256 }
 0x27c   : > { %p1572_p2 = scmp.ne.s32.totalorder %s2074_s11, %s1571_s27  ;;  %p1576_p1 = scmp.lt.u32.totalorder %s2074_s11, %s2163_s5 }
 0x27d   : > { %p1577_p10 = scmp.lt.u32.totalorder %s1575_s25, %s1571_s27  ;;  %p1579_p4 = scmp.lt.u32.totalorder %s1571_s27, %s2074_s11 }
 0x27e   : > { %p1573_p12 = pnand %p1572_p2, %p2192_p6 }
 0x27f   : > { %p1578_p3 = por %p1577_p10, %p1576_p1 }
 0x280   : > { %p1574_p0 = pneg %p1573_p12 }
 0x281   : > { %p1580_p9 = por %p1579_p4, %p1578_p3 }
 0x283   : > { %p1581_p5 = pnand %p1580_p9, %p1574_p0 }
 0x285   : > { %1584 = shalt.err (!%p1581_p5)
}
 0x286   : > { %1319 = dma.vmem_to_hbm [thread:$0]  (%p2192_p6), %s2076_s9, 128, %s2074_s11, %s2087_s24  }
 0x287   : > { %s1585_s18 = scalar_lea.vmem %s2078_s13, 256  ;;  %s1700_s29 = smov [#allocation13]  }
 0x288   : > { %p1586_p7 = scmp.ne.s32.totalorder %s2078_s13, %s1585_s18  ;;  %s1589_s2 = sshll.u32 %s1700_s29, 4  ;;  %s1590_s2 = int_to_ptr.vmem [resolvable:$false] %s1589_s2 }
 0x289   : > { %s1591_s12 = scalar_lea.vmem %s1590_s2, 512  ;;  %p1592_p11 = scmp.lt.s32.totalorder %s2078_s13, %s1590_s2 }
 0x28a   : > { %p1587_p13 = pnand %p1586_p7, %p2192_p6  ;;  %p1593_p2 = scmp.lt.s32.totalorder %s1591_s12, %s1585_s18 }
 0x28c   : > { %p1588_p8 = pneg %p1587_p13  ;;  %p1594_p12 = por %p1593_p2, %p1592_p11 }
 0x28e   : > { %p1595_p0 = pnand %p1594_p12, %p1588_p8 }
 0x290   : > { %1598 = shalt.err (!%p1595_p0)
}
 0x291   : > { %s1599_s9 = scalar_lea.hbm %s2083_s3, 256  ;;  %s1603_s19 = scalar_lea.hbm %s2164_s6, 512 }
 0x292   : > { %p1600_p1 = scmp.ne.s32.totalorder %s2083_s3, %s1599_s9  ;;  %p1604_p4 = scmp.lt.u32.totalorder %s2083_s3, %s2164_s6 }
 0x293   : > { %p1605_p9 = scmp.lt.u32.totalorder %s1603_s19, %s1599_s9  ;;  %p1607_p7 = scmp.lt.u32.totalorder %s1599_s9, %s2083_s3 }
 0x294   : > { %p1601_p10 = pnand %p1600_p1, %p2192_p6 }
 0x295   : > { %p1606_p5 = por %p1605_p9, %p1604_p4 }
 0x296   : > { %p1602_p3 = pneg %p1601_p10 }
 0x297   : > { %p1608_p13 = por %p1607_p7, %p1606_p5 }
 0x299   : > { %p1609_p8 = pnand %p1608_p13, %p1602_p3 }
 0x29b   : > { %1612 = shalt.err (!%p1609_p8)
}
 0x29c   : > { %1320 = dma.vmem_to_hbm [thread:$0]  (%p2192_p6), %s2078_s13, 256, %s2083_s3, %s2087_s24  }
 0x29d PF: > { %s1006_s17 = sand.u32 1, %s1663_s21   ;;  %p2193_p11 = scmp.ne.s32.totalorder %s2176_s30, 0 }
 0x29e   : > { %p2194_p2 = scmp.ge.s32.totalorder %s1683_s26, 2  ;;  %s1007_s27 = scalar_lea.sflag [#allocation4], %s1006_s17 }
 0x2a0   : > { %p1339_p12 = pnand %p2194_p2, %p2193_p11 }
 0x2a2   : > { %1654 = dma.done.wait (!%p1339_p12), %s1007_s27, 16  }
 0x2a3   : > { %1656 = vsyncadd (!%p1339_p12), %s1007_s27, 4294967280  ;;  %s2195_s7 = sadd.s32 4294967294, %s1683_s26  }
 0x2a4   : > { %s1014_s8 = sand.u32 1, %s2195_s7  }
 0x2a5   : > { %s1015_s25 = scalar_lea.sflag [#allocation12], %s1014_s8 }
 0x2a6   : > { %1658 = dma.done.wait (!%p1339_p12), %s1015_s25, 384  }
 0x2a7   : > { %1660 = vsyncadd (!%p1339_p12), %s1015_s25, 4294966912  ;;  %s30_s26 = sadd.s32 1, %s1683_s26   ;;  %s2196_s10 = sld [smem:[#allocation22_spill]] }
 0x2a8   : > { %p27_p6 = scmp.ge.s32.totalorder %s30_s26, 4   ;;  %s2197_s24 = sld [smem:[#allocation20_spill]] }
 0x2a9   : > { %s2198_s25 = sld [smem:[#allocation21_spill]]  ;;  %s2199_s21 = smov %s1667_s22 }
 0x2aa   : > { %s2200_s22 = smov %s1671_s23  ;;  %29 = sbr.rel (!%p27_p6) target bundleno = 14 (0xe), region = 138 }
 0x2ad   : > { %s2201_s23 = smov %s2196_s10 }
 0x2b1   :  { %1029 = vsyncpa [#allocation3], 1 }
 0x2b2   :  { %1031 = vsyncpa [#allocation3 + $0x1], 1 }
 0x2b3   :  { %1032 = vsyncpa [#allocation6], 1 }
 0x2b4   :  { %1034 = vsyncpa [#allocation6 + $0x1], 1 }
 0x2b5   :  { %1035 = vsyncpa [#allocation9], 1 }
 0x2b6   :  { %1036 = vsyncpa [#allocation4], 1 }
 0x2b7   :  { %1038 = vsyncpa [#allocation4 + $0x1], 1 }
 0x2b8   :  { %1039 = vsyncpa [#allocation12], 1 }
 0x2b9   :  { %1041 = vsyncpa [#allocation12 + $0x1], 1 }

</bundles_post_ra>
